<compile_context>
chip_gen: v7x
topology: tpu7x:2x2x1
jax: 0.10.0
libtpu: 0.0.40
codegen_flags: <defaults>
</compile_context>

<pallas_src>
import jax
import jax.numpy as jnp
from jax.experimental import pallas as pl
from jax.experimental.pallas import tpu as pltpu


def _leaky_relu(x, slope=0.01):
    # PyTorch nn.LeakyReLU default negative_slope = 0.01.
    return jnp.where(x > 0, x, slope * x)


def _round_up(x, m):
    return ((x + m - 1) // m) * m


# --------------------------------------------------------------------------
# Kernel
# --------------------------------------------------------------------------
def property_vector_kernel(x_ref, w1_ref, b1_ref, w2_ref, b2_ref, out_ref):
    # Stage 1: fused block-diagonal (cat | num | des) linear + LeakyReLU.
    # x/w1 may be bf16; MXU accumulates in f32 (preferred_element_type).
    h = _leaky_relu(
        jnp.dot(x_ref[...], w1_ref[...], preferred_element_type=jnp.float32)
        + b1_ref[...]
    )
    # Stage 2: out_layer (f32, matches the PyTorch f32 intermediate) + LeakyReLU.
    z = (
        jnp.dot(h, w2_ref[...], preferred_element_type=jnp.float32)
        + b2_ref[...]
    )
    out_ref[...] = _leaky_relu(z).astype(out_ref.dtype)


# --------------------------------------------------------------------------
# Wrapper
# --------------------------------------------------------------------------
def build_fused_params(params, *, n_cat_prop=4, n_num_prop=5, des_size=768,
                       embedding_dimension=128, compute_dtype=jnp.bfloat16):
    """Fold the three stage-1 linears into one lane-aligned block-diagonal W1.

    Rows 0..3          -> cols   0..31   (w_cat)
    Rows 4..8          -> cols  32..63   (w_num)
    Rows 9..776        -> cols  64..127  (w_des)
    Rows 777..k_pad-1  -> zero (input column padding)
    """
    E = embedding_dimension
    H = E // 4
    k_in = n_cat_prop + n_num_prop + des_size          # 777
    k_pad = _round_up(k_in, 128)                        # 896 = 7 * 128

    w1 = jnp.zeros((k_pad, E), jnp.float32)
    w1 = w1.at[:n_cat_prop, :H].set(params["w_cat"])
    w1 = w1.at[n_cat_prop:n_cat_prop + n_num_prop, H:2 * H].set(params["w_num"])
    w1 = w1.at[n_cat_prop + n_num_prop:k_in, 2 * H:].set(params["w_des"])
    b1 = jnp.concatenate(
        [params["b_cat"], params["b_num"], params["b_des"]], axis=1)  # [1, E]

    return {
        "w1": w1.astype(compute_dtype),
        "b1": b1.astype(jnp.float32),
        "w2": params["w_out"].astype(jnp.float32),
        "b2": params["b_out"].astype(jnp.float32),
        "k_pad": k_pad,
    }


def property_vector_forward(user_tensor, params, *,
                            n_cat_prop=4, n_num_prop=5, des_size=768,
                            embedding_dimension=128,
                            batch_tile=512,
                            compute_dtype=jnp.bfloat16):
    B, k_in = user_tensor.shape
    assert k_in == n_cat_prop + n_num_prop + des_size
    E = embedding_dimension

    fused = build_fused_params(
        params, n_cat_prop=n_cat_prop, n_num_prop=n_num_prop,
        des_size=des_size, embedding_dimension=E, compute_dtype=compute_dtype)
    k_pad = fused["k_pad"]

    # --- batch tiling -------------------------------------------------------
    # Pick n_tiles from the target tile, then a tile size that is a multiple
    # of 16 (safe sublane granularity for bf16 and f32) and pad B up to
    # n_tiles * TB so every grid step sees a full, aligned block.
    # TB ~ 512 keeps the double-buffered bf16 input tile at ~1.8 MiB: well
    # inside v5e's 16 MiB scoped VMEM and v7x's 64 MiB physical VMEM, while
    # the grid gets many steps for pipelining / 2-TC sharding.
    n_tiles = max(1, pl.cdiv(B, max(16, batch_tile)))
    TB = _round_up(pl.cdiv(B, n_tiles), 16)
    B_padded = TB * n_tiles
    grid = (n_tiles,)

    # Zero-pad rows (ragged batch) and columns (777 -> 896); cast the big
    # streaming operand to the compute dtype (bf16 by default).
    x = user_tensor.astype(compute_dtype)
    if B_padded != B or k_pad != k_in:
        x = jnp.pad(x, ((0, B_padded - B), (0, k_pad - k_in)))

    w1, b1, w2, b2 = fused["w1"], fused["b1"], fused["w2"], fused["b2"]

    grid_spec = pltpu.PrefetchScalarGridSpec(
        num_scalar_prefetch=0,
        grid=grid,
        in_specs=[
            pl.BlockSpec((TB, k_pad), lambda i: (i, 0)),   # x tile (streams)
            pl.BlockSpec((k_pad, E), lambda i: (0, 0)),    # W1 (constant idx -> resident)
            pl.BlockSpec((1, E), lambda i: (0, 0)),        # b1
            pl.BlockSpec((E, E), lambda i: (0, 0)),        # W2
            pl.BlockSpec((1, E), lambda i: (0, 0)),        # b2
        ],
        out_specs=pl.BlockSpec((TB, E), lambda i: (i, 0)),
    )

    out = pl.pallas_call(
        property_vector_kernel,
        out_shape=jax.ShapeDtypeStruct((B_padded, E), jnp.float32),
        grid_spec=grid_spec,
        compiler_params=pltpu.CompilerParams(
            dimension_semantics=("parallel",)),
    )(x, w1, b1, w2, b2)

    return out[:B] if B_padded != B else out


# --------------------------------------------------------------------------
# Params / reference
# --------------------------------------------------------------------------
def init_params(key, n_cat_prop=4, n_num_prop=5, des_size=768,
                embedding_dimension=128):
    E = embedding_dimension
    H = E // 4
    Q = E // 2
    ks = jax.random.split(key, 8)
    scale = 0.05
    return {
        # weights stored as [in, out] (transpose of torch.nn.Linear.weight)
        "w_cat": scale * jax.random.normal(ks[0], (n_cat_prop, H), jnp.float32),
        "b_cat": scale * jax.random.normal(ks[1], (1, H), jnp.float32),
        "w_num": scale * jax.random.normal(ks[2], (n_num_prop, H), jnp.float32),
        "b_num": scale * jax.random.normal(ks[3], (1, H), jnp.float32),
        "w_des": scale * jax.random.normal(ks[4], (des_size, Q), jnp.float32),
        "b_des": scale * jax.random.normal(ks[5], (1, Q), jnp.float32),
        "w_out": scale * jax.random.normal(ks[6], (E, E), jnp.float32),
        "b_out": scale * jax.random.normal(ks[7], (1, E), jnp.float32),
    }


def reference_forward(user_tensor, params, n_cat_prop=4, n_num_prop=5):
    cat = user_tensor[:, :n_cat_prop]
    num = user_tensor[:, n_cat_prop:n_cat_prop + n_num_prop]
    des = user_tensor[:, n_cat_prop + n_num_prop:]
    h_cat = _leaky_relu(cat @ params["w_cat"] + params["b_cat"])
    h_num = _leaky_relu(num @ params["w_num"] + params["b_num"])
    h_des = _leaky_relu(des @ params["w_des"] + params["b_des"])
    h = jnp.concatenate([h_cat, h_num, h_des], axis=1)
    return _leaky_relu(h @ params["w_out"] + params["b_out"])


# --------------------------------------------------------------------------
if __name__ == "__main__":
    n_cat, n_num, des_size, emb = 4, 5, 768, 128
    B = 20  # deliberately not a tile multiple -> exercises row padding path

    key = jax.random.PRNGKey(0)
    k_x, k_param = jax.random.split(key)
    user_tensor = jax.random.normal(
        k_x, (B, n_cat + n_num + des_size), jnp.float32)
    params = init_params(k_param, n_cat, n_num, des_size, emb)

    # Small batch_tile so the grid has several steps even at this tiny batch.
    out = property_vector_forward(
        user_tensor, params,
        n_cat_prop=n_cat, n_num_prop=n_num,
        des_size=des_size, embedding_dimension=emb,
        batch_tile=16)
    out = jax.block_until_ready(out)
    assert out.shape == (B, emb)

    # Tight check: reference computed on the same bf16-rounded input /
    # stage-1 weights the kernel consumes (stage 2 is f32 in both paths).
    def _bf16_round(a):
        return a.astype(jnp.bfloat16).astype(jnp.float32)

    params_r = dict(params)
    for name in ("w_cat", "w_num", "w_des"):
        params_r[name] = _bf16_round(params[name])
    ref_bf16 = reference_forward(_bf16_round(user_tensor), params_r, n_cat, n_num)
    assert jnp.allclose(out, ref_bf16, atol=2e-3, rtol=2e-3), \
        "mismatch vs bf16-rounded reference"

    # Loose sanity check against the full-f32 PyTorch-equivalent forward.
    ref_f32 = reference_forward(user_tensor, params, n_cat, n_num)
    assert jnp.allclose(out, ref_f32, atol=5e-2, rtol=5e-2), \
        "mismatch vs f32 reference"

    # TODO(synk): dropout is implemented as identity (eval mode); training-mode
    # stochastic dropout would need pltpu.prng_seed/prng_random_bits.
    print("KERNEL_OK")
</pallas_src>

<mosaic_0001>
module attributes {stable_mosaic.version = 11 : i64} {
  func.func @property_vector_kernel(%arg0: i32, %arg1: memref<16x896xbf16, #tpu.memory_space<vmem>>, %arg2: memref<896x128xbf16, #tpu.memory_space<vmem>>, %arg3: memref<1x128xf32, #tpu.memory_space<vmem>>, %arg4: memref<128x128xf32, #tpu.memory_space<vmem>>, %arg5: memref<1x128xf32, #tpu.memory_space<vmem>>, %arg6: memref<16x128xf32, #tpu.memory_space<vmem>>) attributes {dimension_semantics = [#tpu.dimension_semantics<parallel>], iteration_bounds = array<i64: 2>, scalar_prefetch = 0 : i64, scratch_operands = 0 : i64, tpu.core_type = #tpu.core_type<tc>, window_params = [{transform_indices = @transform_0, window_bounds = array<i64: 16, 896>}, {pipeline_mode = #tpu.pipeline_mode<synchronous>, transform_indices = @transform_1, window_bounds = array<i64: 896, 128>}, {pipeline_mode = #tpu.pipeline_mode<synchronous>, transform_indices = @transform_2, window_bounds = array<i64: 1, 128>}, {pipeline_mode = #tpu.pipeline_mode<synchronous>, transform_indices = @transform_3, window_bounds = array<i64: 128, 128>}, {pipeline_mode = #tpu.pipeline_mode<synchronous>, transform_indices = @transform_4, window_bounds = array<i64: 1, 128>}, {transform_indices = @transform_5, window_bounds = array<i64: 16, 128>}]} {
    %c0 = arith.constant 0 : index
    %c0_0 = arith.constant 0 : index
    %0 = vector.load %arg1[%c0, %c0_0] : memref<16x896xbf16, #tpu.memory_space<vmem>>, vector<16x896xbf16>
    %c0_1 = arith.constant 0 : index
    %c0_2 = arith.constant 0 : index
    %1 = vector.load %arg2[%c0_1, %c0_2] : memref<896x128xbf16, #tpu.memory_space<vmem>>, vector<896x128xbf16>
    %cst = arith.constant dense<0.000000e+00> : vector<16x128xf32>
    %2 = tpu.matmul %0, %1, %cst {dimension_numbers = #tpu.dot_dimension_numbers<[1], [0], [0], [1], [0, 0, 1, 1], [], []>} : vector<16x896xbf16>, vector<896x128xbf16>, vector<16x128xf32> -> vector<16x128xf32>
    %c0_3 = arith.constant 0 : index
    %c0_4 = arith.constant 0 : index
    %3 = vector.load %arg3[%c0_3, %c0_4] : memref<1x128xf32, #tpu.memory_space<vmem>>, vector<1x128xf32>
    %4 = vector.broadcast %3 : vector<1x128xf32> to vector<16x128xf32>
    %5 = arith.addf %2, %4 : vector<16x128xf32>
    %cst_5 = arith.constant 0.000000e+00 : f32
    %6 = vector.broadcast %cst_5 : f32 to vector<16x128xf32>
    %7 = arith.cmpf ogt, %5, %6 : vector<16x128xf32>
    %cst_6 = arith.constant 0.00999999977 : f32
    %8 = vector.broadcast %cst_6 : f32 to vector<16x128xf32>
    %9 = arith.mulf %8, %5 : vector<16x128xf32>
    %10 = arith.select %7, %5, %9 : vector<16x128xi1>, vector<16x128xf32>
    %c0_7 = arith.constant 0 : index
    %c0_8 = arith.constant 0 : index
    %11 = vector.load %arg4[%c0_7, %c0_8] : memref<128x128xf32, #tpu.memory_space<vmem>>, vector<128x128xf32>
    %cst_9 = arith.constant dense<0.000000e+00> : vector<16x128xf32>
    %12 = tpu.matmul %10, %11, %cst_9 {dimension_numbers = #tpu.dot_dimension_numbers<[1], [0], [0], [1], [0, 0, 1, 1], [], []>} : vector<16x128xf32>, vector<128x128xf32>, vector<16x128xf32> -> vector<16x128xf32>
    %c0_10 = arith.constant 0 : index
    %c0_11 = arith.constant 0 : index
    %13 = vector.load %arg5[%c0_10, %c0_11] : memref<1x128xf32, #tpu.memory_space<vmem>>, vector<1x128xf32>
    %14 = vector.broadcast %13 : vector<1x128xf32> to vector<16x128xf32>
    %15 = arith.addf %12, %14 : vector<16x128xf32>
    %cst_12 = arith.constant 0.000000e+00 : f32
    %16 = vector.broadcast %cst_12 : f32 to vector<16x128xf32>
    %17 = arith.cmpf ogt, %15, %16 : vector<16x128xf32>
    %cst_13 = arith.constant 0.00999999977 : f32
    %18 = vector.broadcast %cst_13 : f32 to vector<16x128xf32>
    %19 = arith.mulf %18, %15 : vector<16x128xf32>
    %20 = arith.select %17, %15, %19 : vector<16x128xi1>, vector<16x128xf32>
    %c0_14 = arith.constant 0 : index
    %c0_15 = arith.constant 0 : index
    %21 = vector.load %arg6[%c0_14, %c0_15] : memref<16x128xf32, #tpu.memory_space<vmem>>, vector<16x128xf32>
    tpu.vector_store %arg6[%c0_14, %c0_15], %20 {strides = array<i32>} : memref<16x128xf32, #tpu.memory_space<vmem>>, vector<16x128xf32>,
    return
  }
  func.func @transform_0(%arg0: i32) -> (i32, i32) {
    %c0_i32 = arith.constant 0 : i32
    %c0_i32_0 = arith.constant 0 : i32
    return %arg0, %c0_i32 : i32, i32
  }
  func.func @transform_1(%arg0: i32) -> (i32, i32) {
    %c0_i32 = arith.constant 0 : i32
    %c0_i32_0 = arith.constant 0 : i32
    %c0_i32_1 = arith.constant 0 : i32
    return %c0_i32, %c0_i32_0 : i32, i32
  }
  func.func @transform_2(%arg0: i32) -> (i32, i32) {
    %c0_i32 = arith.constant 0 : i32
    %c0_i32_0 = arith.constant 0 : i32
    %c0_i32_1 = arith.constant 0 : i32
    return %c0_i32, %c0_i32_0 : i32, i32
  }
  func.func @transform_3(%arg0: i32) -> (i32, i32) {
    %c0_i32 = arith.constant 0 : i32
    %c0_i32_0 = arith.constant 0 : i32
    %c0_i32_1 = arith.constant 0 : i32
    return %c0_i32, %c0_i32_0 : i32, i32
  }
  func.func @transform_4(%arg0: i32) -> (i32, i32) {
    %c0_i32 = arith.constant 0 : i32
    %c0_i32_0 = arith.constant 0 : i32
    %c0_i32_1 = arith.constant 0 : i32
    return %c0_i32, %c0_i32_0 : i32, i32
  }
  func.func @transform_5(%arg0: i32) -> (i32, i32) {
    %c0_i32 = arith.constant 0 : i32
    %c0_i32_0 = arith.constant 0 : i32
    return %arg0, %c0_i32 : i32, i32
  }
}

</mosaic_0001>

<bundles_post_ra>
// kernel: tpu_custom_call.1
= control target key start
LH: loop header
LB: loop body
LE: loop exit
PB: predicated region body
PF: predicated region fallthrough
CT: control target
= control target key end

     0   :  { %10 = vsyncpa [#allocation3], 0  ;;  %s2018_s0 = inlined_call_operand.hbm [shape: bf16[32,896], index: 0, kind: input, shape index: {}]   ;;  %s2019_s1 = inlined_call_operand.hbm [shape: bf16[896,128], index: 1, kind: input, shape index: {}]   ;;  %s2020_s2 = inlined_call_operand.vmem [shape: f32[1,128], index: 2, kind: input, shape index: {}]   ;;  %s2021_s3 = inlined_call_operand.hbm [shape: f32[128,128], index: 3, kind: input, shape index: {}]   ;;  %s2022_s4 = inlined_call_operand.vmem [shape: f32[1,128], index: 4, kind: input, shape index: {}]   ;;  %s2023_s5 = inlined_call_operand.hbm [shape: f32[32,128], index: 5, kind: output, shape index: {}]  }
   0x1   :  { %12 = vsyncpa [#allocation3 + $0x1], 0 }
   0x2   :  { %13 = vsyncpa [#allocation6], 0 }
   0x3   :  { %14 = vsyncpa [#allocation4], 0 }
   0x4   :  { %16 = vsyncpa [#allocation4 + $0x1], 0  ;;  %s1768_s18 = smov 0   ;;  %s1770_s19 = smov 0  }
   0x5   :  { %s1772_s20 = smov 0   ;;  %s1774_s21 = smov 0  }
   0x6 LB: > { %s1789_s22 = sadd.s32 4294967295, %s1722_s21   ;;  %s1157_s23 = sadd.s32 4294967294, %s1722_s21   ;;  %s1722_s21 = sphi %s1774_s21, %s2043_s21   ;;  %s1718_s20 = sphi %s1772_s20, %s2042_s20   ;;  %s1714_s19 = sphi %s1770_s19, %s2041_s19   ;;  %s1710_s18 = sphi %s1768_s18, %s2040_s18  }
   0x7   : > { %p42_p0 = scmp.ne.s32.totalorder %s1714_s19, %s1710_s18  ;;  %p2024_p1 = scmp.eq.s32.totalorder %s1789_s22, 0 }
   0x8   : > { %p156_p3 = scmp.eq.s32.totalorder %s1157_s23, 1  ;;  %p1158_p5 = scmp.ge.s32.totalorder %s1722_s21, 1 }
   0x9   : > { %p1798_p4 = por %p2024_p1, %p42_p0  ;;  %p163_p7 = scmp.lt.s32.totalorder %s1722_s21, 3 }
   0xa   : > { %p1803_p6 = por %p156_p3, %p42_p0  ;;  %s1724_s27 = smov [#allocation5]  }
   0xb   : > { %s2027_s24 = scalar_select %p1798_p4, 1, 0 }
   0xc   : > { %s2028_s25 = scalar_select %p1803_p6, 1, 0 }
   0xd   : > { %p1808_p8 = pnand %p1158_p5, %p163_p7  ;;  %s175_s28 = sshll.u32 %s1724_s27, 4  ;;  %s1812_s28 = int_to_ptr.vmem [resolvable:$true] %s175_s28 }
   0xe   : > { %s1725_s30 = smov [#allocation7]   ;;  %s1566_s9 = scalar_lea.hbm %s2019_s1, 7168 }
   0xf   : > { %p1435_p9 = pneg %p1808_p8  ;;  %s191_s6 = sshll.u32 %s1725_s30, 4  ;;  %s1823_s6 = int_to_ptr.vmem [resolvable:$true] %s191_s6 }
  0x10   : > { %p1567_p12 = scmp.ne.s32.totalorder %s2019_s1, %s1566_s9  ;;  %p1573_p5 = scmp.lt.u32.totalorder %s1566_s9, %s2019_s1 }
  0x11   : > { %p1819_p11 = pnand %p1435_p9, %p2024_p1 }
  0x13   : > { %p1568_p13 = pneg %p1819_p11 }
  0x15   : > { %p1569_p0 = pnand %p1568_p13, %p1567_p12 }
  0x17   : > { %p1570_p3 = pneg %p1569_p0 }
  0x19   : > { %p1575_p7 = pnand %p1573_p5, %p1570_p3 }
  0x1b   : > { %1578 = shalt.err (!%p1575_p7)
}
  0x1c   : > { %s1579_s14 = scalar_lea.vmem %s1812_s28, 7168  ;;  %p1587_p2 = scmp.lt.s32.totalorder %s1812_s28, %s1812_s28 }
  0x1d   : > { %p1580_p9 = scmp.ne.s32.totalorder %s1812_s28, %s1579_s14  ;;  %p1588_p12 = scmp.lt.s32.totalorder %s1579_s14, %s1579_s14 }
  0x1f   : > { %p1582_p10 = pnand %p1580_p9, %p1568_p13  ;;  %p1589_p0 = por %p1588_p12, %p1587_p2 }
  0x21   : > { %p1583_p1 = pneg %p1582_p10 }
  0x23   : > { %p1590_p6 = pnand %p1589_p0, %p1583_p1 }
  0x25   : > { %1593 = shalt.err (!%p1590_p6)
}
  0x26   : > { %s1726_s15 = smov 64   ;;  %s1727_s16 = smov 4  }
  0x27   : > { %1438 = dma.hbm_to_vmem [thread:$0]  (!%p1819_p11), %s2019_s1, 7168, %s1812_s28, [#allocation6], %s1726_s15, %s1726_s15, %s1727_s16  }
  0x28   : > { %s1594_s7 = scalar_lea.hbm %s2021_s3, 2048 }
  0x29   : > { %p1595_p2 = scmp.ne.s32.totalorder %s2021_s3, %s1594_s7  ;;  %p1601_p10 = scmp.lt.u32.totalorder %s1594_s7, %s2021_s3 }
  0x2b   : > { %p1597_p1 = pnand %p1595_p2, %p1568_p13 }
  0x2d   : > { %p1598_p6 = pneg %p1597_p1 }
  0x2f   : > { %p1603_p3 = pnand %p1601_p10, %p1598_p6 }
  0x31   : > { %1606 = shalt.err (!%p1603_p3)
}
  0x32   : > { %s1607_s28 = scalar_lea.vmem %s1823_s6, 2048  ;;  %p1615_p12 = scmp.lt.s32.totalorder %s1823_s6, %s1823_s6 }
  0x33   : > { %p1608_p5 = scmp.ne.s32.totalorder %s1823_s6, %s1607_s28  ;;  %p1616_p0 = scmp.lt.s32.totalorder %s1607_s28, %s1607_s28 }
  0x35   : > { %p1610_p7 = pnand %p1608_p5, %p1568_p13  ;;  %p1617_p2 = por %p1616_p0, %p1615_p12 }
  0x37   : > { %p1611_p9 = pneg %p1610_p7 }
  0x39   : > { %p1618_p1 = pnand %p1617_p2, %p1611_p9 }
  0x3b   : > { %1621 = shalt.err (!%p1618_p1)
}
  0x3c   : > { %s1728_s12 = smov 128   ;;  %s1729_s13 = smov 8  }
  0x3d   : > { %1441 = dma.hbm_to_vmem [thread:$0]  (!%p1819_p11), %s2021_s3, 2048, %s1823_s6, [#allocation6], %s1728_s12, %s1728_s12, %s1729_s13  }
  0x3e   : > { %s1878_s16 = sadd.s32 1, %s1722_s21   ;;  %s29_s23 = sadd.s32 1, %s1718_s20 }
  0x3f   : > { %s26_s17 = ssub.s32 %s1722_s21, %s1878_s16  ;;  %p36_p6 = scmp.ne.s32.totalorder %s1718_s20, %s1714_s19 }
  0x40   : > { %p27_p13 = scmp.eq.s32.totalorder %s26_s17, 0  ;;  %p37_p10 = scmp.eq.s32.totalorder %s1722_s21, 0 }
  0x41   : > { %p2031_p5 = scmp.eq.s32.totalorder %s1789_s22, 1  ;;  %p1452_p9 = scmp.lt.s32.totalorder %s1722_s21, 2 }
  0x42   : > { %s1887_s27 = scalar_select %p27_p13, %s1718_s20, %s29_s23  }
  0x43   : > { %p38_p3 = por %p37_p10, %p36_p6  ;;  %p1891_p7 = por %p2031_p5, %p36_p6 }
  0x44   : > { %s208_s29 = sand.u32 1, %s1718_s20   ;;  %s1421_s6 = smul.u32 896, %s1722_s21 }
  0x45   : > { %s2032_s30 = scalar_select %p1891_p7, 1, 0 }
  0x46   : > { %s1420_s7 = smul.u32 56, %s208_s29  ;;  %p1898_p11 = pnand %p1452_p9, %p38_p3 }
  0x47   : > { %s1905_s11 = scalar_lea.hbm %s2018_s0, %s1421_s6  ;;  %s1909_s13 = scalar_lea.sflag [#allocation3], %s208_s29 }
  0x48   : > { %s212_s28 = scalar_lea.vmem [#allocation2], %s1420_s7  ;;  %s1622_s14 = scalar_lea.hbm %s1905_s11, 896 }
  0x49   : > { %s220_s12 = sshll.u32 %s212_s28, 4  ;;  %p1623_p12 = scmp.ne.s32.totalorder %s1905_s11, %s1622_s14  ;;  %s1907_s12 = int_to_ptr.vmem [resolvable:$true] %s220_s12 }
  0x4a   : > { %p1624_p0 = pneg %p1898_p11  ;;  %s1627_s23 = scalar_lea.hbm %s2018_s0, 1792 }
  0x4b   : > { %p1628_p13 = scmp.lt.u32.totalorder %s1905_s11, %s2018_s0  ;;  %p1629_p6 = scmp.lt.u32.totalorder %s1627_s23, %s1622_s14 }
  0x4c   : > { %p1625_p2 = pnand %p1624_p0, %p1623_p12  ;;  %p1631_p3 = scmp.lt.u32.totalorder %s1622_s14, %s1905_s11 }
  0x4d   : > { %p1630_p10 = por %p1629_p6, %p1628_p13 }
  0x4e   : > { %p1626_p1 = pneg %p1625_p2 }
  0x4f   : > { %p1632_p5 = por %p1631_p3, %p1630_p10 }
  0x51   : > { %p1633_p9 = pnand %p1632_p5, %p1626_p1 }
  0x53   : > { %1636 = shalt.err (!%p1633_p9)
}
  0x54   : > { %s1637_s29 = scalar_lea.vmem %s1907_s12, 896  ;;  %s1730_s7 = smov [#allocation2]  }
  0x55   : > { %p1638_p12 = scmp.ne.s32.totalorder %s1907_s12, %s1637_s29  ;;  %s1642_s10 = sshll.u32 %s1730_s7, 4  ;;  %s1643_s10 = int_to_ptr.vmem [resolvable:$false] %s1642_s10 }
  0x56   : > { %s1644_s28 = scalar_lea.vmem %s1643_s10, 1792  ;;  %p1645_p4 = scmp.lt.s32.totalorder %s1907_s12, %s1643_s10 }
  0x57   : > { %p1640_p2 = pnand %p1638_p12, %p1624_p0  ;;  %p1646_p13 = scmp.lt.s32.totalorder %s1644_s28, %s1637_s29 }
  0x59   : > { %p1641_p7 = pneg %p1640_p2  ;;  %p1647_p6 = por %p1646_p13, %p1645_p4 }
  0x5b   : > { %p1648_p10 = pnand %p1647_p6, %p1641_p7 }
  0x5d   : > { %1651 = shalt.err (!%p1648_p10)
}
  0x5e   : > { %s1731_s14 = smov 448   ;;  %s1732_s15 = smov 28  }
  0x5f   : > { %1445 = dma.hbm_to_vmem [thread:$0]  (!%p1898_p11), %s1905_s11, 896, %s1907_s12, %s1909_s13, %s1731_s14, %s1731_s14, %s1732_s15  }
  0x60   : > { %232 = sbr.rel (%p1808_p8) target bundleno = 629 (0x275), region = 40  ;;  %s1940_s17 = sand.u32 (!%p1808_p8), 1, %s1714_s19  }
  0x61   : > { %s1422_s23 = smul.u32 (!%p1808_p8), 56, %s1940_s17  ;;  %s235_s6 = scalar_lea.sflag (!%p1808_p8), [#allocation3], %s1940_s17 }
  0x62   : > { %p2034_p4 = scmp.ne.s32.totalorder (!%p1808_p8), %s2027_s24, 0 }
  0x63   : > { %s1944_s9 = scalar_lea.vmem (!%p1808_p8), [#allocation2], %s1422_s23 }
  0x67   : > { %1697 = dma.done.wait (%p2034_p4), %s235_s6, 896  }
  0x68   : > { %1699 = vsyncadd (%p2034_p4), %s235_s6, 4294966400  ;;  %p2035_p7 = scmp.eq.s32.totalorder %s1789_s22, 0 }
  0x6a   : > { %1701 = dma.done.wait (%p2035_p7), [#allocation6], 9216   ;;  %p2036_p8 = pmov %p2035_p7 }
  0x6b   : > { %v1500_v0 = vld [vmem:[#allocation5 + $0x40] sm:$0xff]   ;;  %v1504_v4 = vld [vmem:[#allocation5 + $0x48] sm:$0xff]   ;;  %v1508_v8 = vld [vmem:[#allocation5 + $0x50] sm:$0xff]   ;;  %v1733_v38 = vmov 0.0   ;;  %vm1734_vm0 = vmmov 0   ;;  %s1168_s8 = sshll.u32 %s1940_s17, 4 }
  0x6c   : > { %1703 = vsyncadd (%p2036_p8), [#allocation6], 4294958080  ;;  %v1501_v1 = vld [vmem:[#allocation5] sm:$0xff]   ;;  %1240 = vmatprep.subr.bf16.mxu0 %v1500_v0  ;;  %v1505_v5 = vld [vmem:[#allocation5 + $0x8] sm:$0xff]   ;;  %s272_s13 = scalar_lea.vmem [#allocation8], %s1168_s8  ;;  %s1239_s7 = sshll.u32 %s1789_s22, 8 }
  0x6d   : > { %v1502_v2 = vld [vmem:[#allocation5 + $0xc0] sm:$0xff]   ;;  %1241 = vmatpush3.bf16.msra.mxu0 %v1501_v1  ;;  %v1506_v6 = vld [vmem:[#allocation5 + $0xc8] sm:$0xff]   ;;  %v1509_v9 = vld [vmem:[#allocation5 + $0x10] sm:$0xff]   ;;  %s1065_s29 = sshll.u32 %s272_s13, 4  ;;  %s1974_s14 = scalar_lea.hbm %s2023_s5, %s1239_s7  ;;  %s1969_s29 = int_to_ptr.vmem [resolvable:$true] %s1065_s29 }
  0x6e   : > { %v1503_v3 = vld [vmem:[#allocation5 + $0x80] sm:$0xff]   ;;  %1262 = vmatprep.subr.bf16.mxu1 %v1502_v2  ;;  %1242 = vmatprep.subr.bf16.mxu0 %v1504_v4  ;;  %v1507_v7 = vld [vmem:[#allocation5 + $0x88] sm:$0xff]   ;;  %v1510_v10 = vld [vmem:[#allocation5 + $0xd0] sm:$0xff]   ;;  %s1052_s22 = scalar_lea.sflag [#allocation4], %s1940_s17  ;;  %s1652_s15 = scalar_lea.vmem %s1969_s29, 256 }
  0x6f   : > { %1263 = vmatpush3.bf16.msra.mxu1 %v1503_v3  ;;  %v1511_v11 = vld [vmem:[#allocation5 + $0x90] sm:$0xff]   ;;  %v1512_v12 = vld [vmem:[#allocation5 + $0x58] sm:$0xff]   ;;  %v1516_v16 = vld [vmem:[#allocation5 + $0x60] sm:$0xff]   ;;  %p1653_p11 = scmp.ne.s32.totalorder %s1969_s29, %s1652_s15  ;;  %p2037_p0 = scmp.ne.s32.totalorder %s2032_s30, 0 }
  0x70   : > { %1264 = vmatprep.subr.bf16.mxu1 %v1506_v6  ;;  %v1513_v13 = vld [vmem:[#allocation5 + $0x18] sm:$0xff]   ;;  %v1517_v17 = vld [vmem:[#allocation5 + $0x20] sm:$0xff]   ;;  %v1520_v20 = vld [vmem:[#allocation5 + $0x68] sm:$0xff]   ;;  %s1735_s23 = smov [#allocation8]  }
  0x71   : > { %1243 = vmatpush3.bf16.msra.mxu0 %v1505_v5  ;;  %v1514_v14 = vld [vmem:[#allocation5 + $0xd8] sm:$0xff]   ;;  %v1518_v18 = vld [vmem:[#allocation5 + $0xe0] sm:$0xff]   ;;  %v1521_v21 = vld [vmem:[#allocation5 + $0x28] sm:$0xff]   ;;  %p1654_p1 = pnand %p1653_p11, %p2037_p0  ;;  %s1656_s6 = sshll.u32 %s1735_s23, 4  ;;  %s1657_s6 = int_to_ptr.vmem [resolvable:$false] %s1656_s6 }
  0x72   : > { %1244 = vmatprep.subr.bf16.mxu0 %v1508_v8  ;;  %v1515_v15 = vld [vmem:[#allocation5 + $0x98] sm:$0xff]   ;;  %v1519_v19 = vld [vmem:[#allocation5 + $0xa0] sm:$0xff]   ;;  %v1522_v22 = vld [vmem:[#allocation5 + $0xe8] sm:$0xff]   ;;  %p1659_p5 = scmp.lt.s32.totalorder %s1969_s29, %s1657_s6 }
  0x73   : > { %1265 = vmatpush3.bf16.msra.mxu1 %v1507_v7  ;;  %v1523_v23 = vld [vmem:[#allocation5 + $0xa8] sm:$0xff]   ;;  %v1524_v24 = vld [vmem:[#allocation5 + $0x70] sm:$0xff]   ;;  %v1528_v28 = vld [vmem:[#allocation5 + $0x78] sm:$0xff]   ;;  %p1655_p3 = pneg %p1654_p1 }
  0x74   : > { %1266 = vmatprep.subr.bf16.mxu1 %v1510_v10  ;;  %v1525_v25 = vld [vmem:[#allocation5 + $0x30] sm:$0xff]   ;;  %v1529_v29 = vld [vmem:[#allocation5 + $0x38] sm:$0xff]   ;;  %v1535_v34 = vld [vmem:[#allocation5 + $0x140] sm:$0xff]  }
  0x75   : > { %1245 = vmatpush3.bf16.msra.mxu0 %v1509_v9  ;;  %v1526_v26 = vld [vmem:[#allocation5 + $0xf0] sm:$0xff]   ;;  %v1530_v30 = vld [vmem:[#allocation5 + $0xf8] sm:$0xff]   ;;  %v1539_v37 = vld [vmem:[#allocation5 + $0x100] sm:$0xff]  }
  0x76   : > { %1246 = vmatprep.subr.bf16.mxu0 %v1512_v12  ;;  %v1527_v27 = vld [vmem:[#allocation5 + $0xb0] sm:$0xff]   ;;  %v1534_v33 = vld [vmem:[#allocation5 + $0xb8] sm:$0xff]   ;;  %v1540_v39 = vld [vmem:[#allocation5 + $0x180] sm:$0xff]  }
  0x77   : > { %1267 = vmatpush3.bf16.msra.mxu1 %v1511_v11  ;;  %v1531_v31 = vld [vmem:[%s1944_s9] ss:$28 sps:$4 sm:$0xff]   ;;  %v1536_v35 = vld [vmem:[%s1944_s9 + $0x8] ss:$28 sps:$4 sm:$0xff]   ;;  %v1563_v58 = vld [vmem:[%s1944_s9 + $0x14] ss:$28 sps:$4 sm:$0xff]  }
  0x78   : > { %1268 = vmatprep.subr.bf16.mxu1 %v1514_v14  ;;  %v1533_v32 = vld [vmem:[%s1944_s9 + $0x4] ss:$28 sps:$4 sm:$0xff]   ;;  %v1538_v36 = vld [vmem:[%s1944_s9 + $0xc] ss:$28 sps:$4 sm:$0xff]   ;;  %v1550_v49 = vld [vmem:[#allocation5 + $0x160] sm:$0xff]  }
  0x79   : > { %1247 = vmatpush3.bf16.msra.mxu0 %v1513_v13  ;;  %807 = vmatprep.mubr.bf16.mxu0 %v1533_v32  ;;  %v1541_v40 = vld [vmem:[#allocation5 + $0x148] sm:$0xff]   ;;  %v1544_v43 = vld [vmem:[#allocation5 + $0x150] sm:$0xff]   ;;  %v1547_v46 = vld [vmem:[#allocation5 + $0x158] sm:$0xff]  }
  0x7a   : > { %1248 = vmatprep.subr.bf16.mxu0 %v1516_v16  ;;  %848 = vmatprep.mubr.bf16.mxu1 %v1538_v36  ;;  %v1542_v41 = vld [vmem:[#allocation5 + $0x108] sm:$0xff]   ;;  %v1545_v44 = vld [vmem:[#allocation5 + $0x110] sm:$0xff]   ;;  %v1548_v47 = vld [vmem:[#allocation5 + $0x118] sm:$0xff]  }
  0x7b   : > { %1269 = vmatpush3.bf16.msra.mxu1 %v1515_v15  ;;  %v1543_v42 = vld [vmem:[#allocation5 + $0x188] sm:$0xff]   ;;  %v1546_v45 = vld [vmem:[#allocation5 + $0x190] sm:$0xff]   ;;  %v1549_v48 = vld [vmem:[#allocation5 + $0x198] sm:$0xff]  }
  0x7c   : > { %1270 = vmatprep.subr.bf16.mxu1 %v1518_v18  ;;  %v1551_v50 = vld [vmem:[#allocation5 + $0x120] sm:$0xff]   ;;  %v1553_v52 = vld [vmem:[#allocation5 + $0x168] sm:$0xff]   ;;  %v1556_v55 = vld [vmem:[#allocation5 + $0x170] sm:$0xff]  }
  0x7d   : > { %1249 = vmatpush3.bf16.msra.mxu0 %v1517_v17  ;;  %v1552_v51 = vld [vmem:[#allocation5 + $0x1a0] sm:$0xff]   ;;  %v1554_v53 = vld [vmem:[#allocation5 + $0x128] sm:$0xff]   ;;  %v1557_v56 = vld [vmem:[#allocation5 + $0x130] sm:$0xff]  }
  0x7e   : > { %1250 = vmatprep.subr.bf16.mxu0 %v1520_v20  ;;  %v1555_v54 = vld [vmem:[#allocation5 + $0x1a8] sm:$0xff]   ;;  %v1558_v57 = vld [vmem:[#allocation5 + $0x1b0] sm:$0xff]   ;;  %v1559_v59 = vld [vmem:[#allocation5 + $0x178] sm:$0xff]  }
  0x7f   : > { %1271 = vmatpush3.bf16.msra.mxu1 %v1519_v19  ;;  %v1560_v60 = vld [vmem:[#allocation5 + $0x138] sm:$0xff]   ;;  %v945_v0 = vld [vmem:[#allocation7] sm:$0xff]  ;;  %v946_v1 = vld [vmem:[#allocation7 + $0x8] sm:$0xff] }
  0x80   : > { %1272 = vmatprep.subr.bf16.mxu1 %v1522_v22  ;;  %v1564_v61 = vld [vmem:[#allocation5 + $0x1b8] sm:$0xff]   ;;  %v947_v2 = vld [vmem:[#allocation7 + $0x10] sm:$0xff]  ;;  %v1388_v3 = vpack.c.bf16 %v946_v1, %v945_v0  ;;  %v949_v6 = vld [vmem:[#allocation7 + $0x20] sm:$0xff] }
  0x81   : > { %1251 = vmatpush3.bf16.msra.mxu0 %v1521_v21  ;;  %v1561_v62 = vld [vmem:[%s1944_s9 + $0x10] ss:$28 sps:$4 sm:$0xff]   ;;  %v1565_v63 = vld [vmem:[%s1944_s9 + $0x18] ss:$28 sps:$4 sm:$0xff]   ;;  %s1658_s9 = scalar_lea.vmem %s1657_s6, 512 }
  0x82   : > { %1252 = vmatprep.subr.bf16.mxu0 %v1524_v24  ;;  %v948_v4 = vld [vmem:[#allocation7 + $0x18] sm:$0xff]  ;;  %v950_v7 = vld [vmem:[#allocation7 + $0x28] sm:$0xff]  ;;  %v951_v9 = vld [vmem:[#allocation7 + $0x30] sm:$0xff]  ;;  %p1660_p9 = scmp.lt.s32.totalorder %s1658_s9, %s1652_s15 }
  0x83   : > { %1273 = vmatpush3.bf16.msra.mxu1 %v1523_v23  ;;  %v1392_v5 = vpack.c.bf16 %v948_v4, %v947_v2  ;;  %v1396_v8 = vpack.c.bf16 %v950_v7, %v949_v6  ;;  %v952_v10 = vld [vmem:[#allocation7 + $0x38] sm:$0xff]  ;;  %v953_v12 = vld [vmem:[#allocation7 + $0x40] sm:$0xff]  ;;  %v954_v13 = vld [vmem:[#allocation7 + $0x48] sm:$0xff] }
  0x84   : > { %1274 = vmatprep.subr.bf16.mxu1 %v1526_v26  ;;  %v1400_v11 = vpack.c.bf16 %v952_v10, %v951_v9  ;;  %v1404_v14 = vpack.c.bf16 %v954_v13, %v953_v12  ;;  %v955_v15 = vld [vmem:[#allocation7 + $0x50] sm:$0xff]  ;;  %v956_v16 = vld [vmem:[#allocation7 + $0x58] sm:$0xff]  ;;  %v957_v18 = vld [vmem:[#allocation7 + $0x60] sm:$0xff]  ;;  %p1661_p12 = por %p1660_p9, %p1659_p5 }
  0x85   : > { %1253 = vmatpush3.bf16.msra.mxu0 %v1525_v25  ;;  %v1408_v17 = vpack.c.bf16 %v956_v16, %v955_v15  ;;  %v958_v19 = vld [vmem:[#allocation7 + $0x68] sm:$0xff]  ;;  %v959_v21 = vld [vmem:[#allocation7 + $0x70] sm:$0xff]  ;;  %v960_v22 = vld [vmem:[#allocation7 + $0x78] sm:$0xff] }
  0x86   : > { %1254 = vmatprep.subr.bf16.mxu0 %v1528_v28  ;;  %v1412_v20 = vpack.c.bf16 %v958_v19, %v957_v18  ;;  %v1416_v23 = vpack.c.bf16 %v960_v22, %v959_v21  ;;  %v1169_v25 = vld [vmem:[%s2020_s2] ss:$0 sm:$0xff]  ;;  %p1662_p2 = pnand %p1661_p12, %p1655_p3 }
  0x87   : > { %1275 = vmatpush3.bf16.msra.mxu1 %v1527_v27 }
  0x88   : > { %1276 = vmatprep.subr.bf16.mxu1 %v1530_v30 }
  0x89   : > { %1255 = vmatpush3.bf16.msra.mxu0 %v1529_v29 }
  0x8a   : > { %1284 = vmatprep.subr.bf16.mxu0 %v1535_v34 }
  0x8b   : > { %1277 = vmatpush3.bf16.msra.mxu1 %v1534_v33 }
  0x8c   : > { %808 = vmatmul.mubr.bf16.vlgmr.msra.gmra.mrb[0].mxu0 %v1531_v31  ;;  %1333 = vmatprep.subr.bf16.mxu1 %v1733_v38 }
  0x8d   : > { %1285 = vmatpush3.bf16.msra.mxu0 %v1539_v37  ;;  %889 = vmatprep.mubr.bf16.mxu0 %v1563_v58 }
  0x8e   : > { %849 = vmatmul.mubr.bf16.vlgmr.msra.gmra.mrb[0].mxu1 %v1536_v35  ;;  %1286 = vmatprep.subr.bf16.mxu0 %v1541_v40 }
  0x8f   : > { %1334 = vmatpush3.bf16.msra.mxu1 %v1540_v39  ;;  %1349 = vmatprep.mubr.msk.bf16.mxu1 %vm1734_vm0, %v1733_v38 }
  0x90   : > { %1335 = vmatprep.subr.bf16.mxu1 %v1733_v38 }
  0x91   : > { %1287 = vmatpush3.bf16.msra.mxu0 %v1542_v41 }
  0x92   : > { %1288 = vmatprep.subr.bf16.mxu0 %v1544_v43 }
  0x93   : > { %1336 = vmatpush3.bf16.msra.mxu1 %v1543_v42 }
  0x94   : > { %1337 = vmatprep.subr.bf16.mxu1 %v1733_v38 }
  0x95   : > { %1289 = vmatpush3.bf16.msra.mxu0 %v1545_v44 }
  0x96   : > { %1290 = vmatprep.subr.bf16.mxu0 %v1547_v46 }
  0x97   : > { %1338 = vmatpush3.bf16.msra.mxu1 %v1546_v45 }
  0x98   : > { %1339 = vmatprep.subr.bf16.mxu1 %v1733_v38 }
  0x99   : > { %1291 = vmatpush3.bf16.msra.mxu0 %v1548_v47 }
  0x9a   : > { %1292 = vmatprep.subr.bf16.mxu0 %v1550_v49 }
  0x9b   : > { %1340 = vmatpush3.bf16.msra.mxu1 %v1549_v48 }
  0x9c   : > { %1341 = vmatprep.subr.bf16.mxu1 %v1733_v38 }
  0x9d   : > { %1293 = vmatpush3.bf16.msra.mxu0 %v1551_v50 }
  0x9e   : > { %1294 = vmatprep.subr.bf16.mxu0 %v1553_v52 }
  0x9f   : > { %1342 = vmatpush3.bf16.msra.mxu1 %v1552_v51 }
  0xa0   : > { %1343 = vmatprep.subr.bf16.mxu1 %v1733_v38 }
  0xa1   : > { %1295 = vmatpush3.bf16.msra.mxu0 %v1554_v53 }
  0xa2   : > { %1296 = vmatprep.subr.bf16.mxu0 %v1556_v55 }
  0xa3   : > { %1344 = vmatpush3.bf16.msra.mxu1 %v1555_v54 }
  0xa4   : > { %1345 = vmatprep.subr.bf16.mxu1 %v1733_v38 }
  0xa5   : > { %1297 = vmatpush3.bf16.msra.mxu0 %v1557_v56 }
  0xa6   : > { %1298 = vmatprep.subr.bf16.mxu0 %v1559_v59  ;;  %v1233_v59 = vld [vmem:[%s2022_s4] ss:$0 sm:$0xff] }
  0xa7   : > { %1346 = vmatpush3.bf16.msra.mxu1 %v1558_v57 }
  0xa8   : > { %1347 = vmatprep.subr.bf16.mxu1 %v1733_v38 }
  0xa9   : > { %1299 = vmatpush3.bf16.msra.mxu0 %v1560_v60 }
  0xaa   : > { %1389 = vmatprep.subr.bf16.mxu0 %v1388_v3 }
  0xab   : > { %1348 = vmatpush3.bf16.msra.mxu1 %v1564_v61 }
  0xac   : > { %890 = vmatmul.mubr.bf16.vlgmr.msra.gmra.mrb[4].mxu0 %v1561_v62 }
  0xad   : > { %1391 = vmatpush3.bf16.msra.mxu0 %v1388_v3 }
  0xae   : > { %1350 = vmatmul.mubr.bf16.vlgmr.msra.gmra.mrb[4].mxu1 %v1565_v63  ;;  %1393 = vmatprep.subr.bf16.mxu0 %v1392_v5 }
  0xb1   : > { %1395 = vmatpush3.bf16.msra.mxu0 %v1392_v5 }
  0xb2   : > { %1397 = vmatprep.subr.bf16.mxu0 %v1396_v8 }
  0xb5   : > { %1399 = vmatpush3.bf16.msra.mxu0 %v1396_v8 }
  0xb6   : > { %1401 = vmatprep.subr.bf16.mxu0 %v1400_v11 }
  0xb9   : > { %1403 = vmatpush3.bf16.msra.mxu0 %v1400_v11 }
  0xba   : > { %1405 = vmatprep.subr.bf16.mxu0 %v1404_v14 }
  0xbd   : > { %1407 = vmatpush3.bf16.msra.mxu0 %v1404_v14 }
  0xbe   : > { %1409 = vmatprep.subr.bf16.mxu0 %v1408_v17 }
  0xc1   : > { %1411 = vmatpush3.bf16.msra.mxu0 %v1408_v17 }
  0xc2   : > { %1413 = vmatprep.subr.bf16.mxu0 %v1412_v20 }
  0xc5   : > { %1415 = vmatpush3.bf16.msra.mxu0 %v1412_v20 }
  0xc6   : > { %1417 = vmatprep.subr.bf16.mxu0 %v1416_v23 }
  0xc9   : > { %1419 = vmatpush3.bf16.msra.mxu0 %v1416_v23 }
 0x15f   : > { %v1256_v24 = vpop.f32.mrb[0].mxu0 }
 0x160   : > { %v1257_v26 = vpop.f32.mrb[1].mxu0 }
 0x161   : > { %v1258_v27 = vadd.f32 %v1257_v26, %v1256_v24  ;;  %v1259_v28 = vpop.f32.mrb[2].mxu0  ;;  %v1278_v29 = vpop.f32.mrb[0].mxu1 }
 0x162   : > { %v1260_v30 = vpop.f32.mrb[3].mxu0  ;;  %v1279_v33 = vpop.f32.mrb[1].mxu1 }
 0x163   : > { %v810_v31 = vadd.f32 %v1258_v27, %v1169_v25  ;;  %v1261_v32 = vadd.f32 %v1260_v30, %v1259_v28  ;;  %v1280_v34 = vadd.f32 %v1279_v33, %v1278_v29  ;;  %v1281_v35 = vpop.f32.mrb[2].mxu1 }
 0x164   : > { %v1282_v37 = vpop.f32.mrb[3].mxu1 }
 0x165   : > { %v813_v36 = vadd.f32 %v1261_v32, %v1169_v25  ;;  %v851_v38 = vadd.f32 %v1280_v34, %v810_v31  ;;  %v1283_v39 = vadd.f32 %v1282_v37, %v1281_v35 }
 0x167   : > { %v854_v40 = vadd.f32 %v1283_v39, %v813_v36 }
 0x17f   : > { %v1300_v41 = vpop.f32.mrb[4].mxu0 }
 0x180   : > { %v1301_v42 = vpop.f32.mrb[5].mxu0 }
 0x181   : > { %v932_v43 = vpop.f32.mrb[4].mxu1  ;;  %v1302_v44 = vadd.f32 %v1301_v42, %v1300_v41  ;;  %v1303_v45 = vpop.f32.mrb[6].mxu0 }
 0x182   : > { %v1351_v46 = vpop.f32.mrb[5].mxu1  ;;  %v1304_v47 = vpop.f32.mrb[7].mxu0 }
 0x183   : > { %v935_v48 = vpop.f32.mrb[6].mxu1  ;;  %v892_v49 = vadd.f32 %v1302_v44, %v851_v38  ;;  %v1305_v50 = vadd.f32 %v1304_v47, %v1303_v45 }
 0x184   : > { %v1352_v51 = vpop.f32.mrb[7].mxu1 }
 0x185   : > { %v933_v52 = vadd.f32 %v932_v43, %v892_v49  ;;  %v895_v53 = vadd.f32 %v1305_v50, %v854_v40 }
 0x187   : > { %v941_v54 = vmul.f32 0.01, %v933_v52  ;;  %v936_v55 = vadd.f32 %v935_v48, %v895_v53  ;;  %vm939_vm1 = vcmp.gt.f32.partialorder %v933_v52, 0.0 }
 0x189   : > { %vm940_vm2 = vcmp.gt.f32.partialorder %v936_v55, 0.0  ;;  %v942_v56 = vmul.f32 0.01, %v936_v55  ;;  %v943_v57 = vsel %vm939_vm1, %v933_v52, %v941_v54 }
 0x18a   : > { %1385 = vmatprep.mubr.f32.mxu0 %v943_v57 }
 0x18b   : > { %v944_v58 = vsel %vm940_vm2, %v936_v55, %v942_v56 }
 0x18c   : > { %1386 = vmatmul.mubr.f32.vlgmr.msra.gmra.mrb[8].mxu0 %v944_v58 }
 0x25f   : > { %v1387_v60 = vpop.f32.mrb[8].mxu0 }
 0x260   : > { %v1040_v61 = vadd.f32 %v1387_v60, %v1233_v59  ;;  %v1034_v62 = vpop.f32.mrb[9].mxu0 }
 0x261   : > { %v1035_v63 = vadd.f32 %v1233_v59, %v1034_v62 }
 0x262   : > { %vm1044_vm3 = vcmp.gt.f32.partialorder %v1040_v61, 0.0  ;;  %v1046_v0 = vmul.f32 0.01, %v1040_v61 }
 0x263   : > { %vm1043_vm4 = vcmp.gt.f32.partialorder %v1035_v63, 0.0  ;;  %v1045_v1 = vmul.f32 0.01, %v1035_v63 }
 0x264   : > { %v1048_v2 = vsel %vm1044_vm3, %v1040_v61, %v1046_v0 }
 0x265   : > { %1050 = vst [vmem:[%s272_s13 + $0x8] sm:$0xff] %v1048_v2  ;;  %v1047_v3 = vsel %vm1043_vm4, %v1035_v63, %v1045_v1 }
 0x266   : > { %1049 = vst [vmem:[%s272_s13] sm:$0xff] %v1047_v3 }
 0x267   : > { %1665 = shalt.err (!%p1662_p2)
}
 0x268   : > { %s1666_s24 = scalar_lea.hbm %s1974_s14, 256  ;;  %s1670_s11 = scalar_lea.hbm %s2023_s5, 512 }
 0x269   : > { %p1667_p13 = scmp.ne.s32.totalorder %s1974_s14, %s1666_s24  ;;  %p1671_p4 = scmp.lt.u32.totalorder %s1974_s14, %s2023_s5 }
 0x26a   : > { %p1672_p7 = scmp.lt.u32.totalorder %s1670_s11, %s1666_s24  ;;  %p1674_p11 = scmp.lt.u32.totalorder %s1666_s24, %s1974_s14 }
 0x26b   : > { %p1668_p6 = pnand %p1667_p13, %p2037_p0 }
 0x26c   : > { %p1673_p8 = por %p1672_p7, %p1671_p4 }
 0x26d   : > { %p1669_p10 = pneg %p1668_p6 }
 0x26e   : > { %p1675_p1 = por %p1674_p11, %p1673_p8 }
 0x270   : > { %p1676_p3 = pnand %p1675_p1, %p1669_p10 }
 0x272   : > { %1679 = shalt.err (!%p1676_p3)
}
 0x273   : > { %s1736_s7 = smov 128   ;;  %s1737_s10 = smov 8  }
 0x274   : > { %1433 = dma.vmem_to_hbm [thread:$0]  (%p2037_p0), %s1969_s29, 256, %s1974_s14, %s1052_s22, %s1736_s7, %s1736_s7, %s1737_s10  }
 0x275 PF: > { %s1080_s28 = sand.u32 1, %s1710_s18   ;;  %p2038_p5 = scmp.ne.s32.totalorder %s2028_s25, 0 }
 0x276   : > { %p2039_p9 = scmp.ge.s32.totalorder %s1722_s21, 2  ;;  %s1081_s15 = scalar_lea.sflag [#allocation4], %s1080_s28 }
 0x278   : > { %p1447_p12 = pnand %p2039_p9, %p2038_p5 }
 0x27a   : > { %1705 = dma.done.wait (!%p1447_p12), %s1081_s15, 256  }
 0x27b   : > { %1707 = vsyncadd (!%p1447_p12), %s1081_s15, 4294967040  ;;  %p19_p2 = scmp.ge.s32.totalorder %s1878_s16, 4   ;;  %s2040_s18 = smov %s1714_s19 }
 0x27c   : > { %s2041_s19 = smov %s1718_s20  ;;  %s2042_s20 = smov %s1887_s27 }
 0x27d   : > { %s2043_s21 = smov %s1878_s16  ;;  %21 = sbr.rel (!%p19_p2) target bundleno = 6 (0x6), region = 93 }
 0x284   :  { %1086 = vsyncpa [#allocation3], 1 }
 0x285   :  { %1088 = vsyncpa [#allocation3 + $0x1], 1 }
 0x286   :  { %1089 = vsyncpa [#allocation6], 1 }
 0x287   :  { %1090 = vsyncpa [#allocation4], 1 }
 0x288   :  { %1092 = vsyncpa [#allocation4 + $0x1], 1 }

</bundles_post_ra>
